<compile_context>
chip_gen: v7x
topology: tpu7x:2x2x1
jax: 0.10.0
libtpu: 0.0.40
codegen_flags: <defaults>
</compile_context>

<pallas_src>
import functools

import jax
import jax.numpy as jnp
from jax.experimental import pallas as pl
from jax.experimental.pallas import tpu as pltpu


def _classifier_kernel(x_ref, w1_ref, b1_ref, w2_ref, b2_ref, o_ref):
    # x_ref: (TB, 120) bf16 tile of the (padded) batch.
    # fc1: bf16 x bf16 -> f32 accumulation on the MXU.
    h = jnp.dot(x_ref[...], w1_ref[...], preferred_element_type=jnp.float32)
    h = jnp.tanh(h + b1_ref[...])  # bias + tanh in f32 (EUP)
    # fc2: tiny (84 x C) weight, kept f32.
    out = jnp.dot(h, w2_ref[...], preferred_element_type=jnp.float32) + b2_ref[...]
    o_ref[...] = out.astype(o_ref.dtype)


def _round_up(x, m):
    return (x + m - 1) // m * m


@functools.partial(jax.jit, static_argnames=("batch_tile",))
def classifier_forward(x, w1_t, b1, w2_t, b2, *, batch_tile=2048):
    """x: [N, 120] f32 -> logits [N, num_classes] f32.

    Weights are passed pre-transposed as [in, out] and biases as [1, out],
    so the kernel computes y = tanh(x @ W1^T + b1) @ W2^T + b2, matching the
    PyTorch forward.
    """
    n, in_dim = x.shape
    assert in_dim == 120
    num_classes = w2_t.shape[1]

    # Effective tile: large for throughput (mem-bound on the x read) but never
    # larger than the 8-rounded batch; pad N up to a tile multiple so any N works.
    tb = _round_up(min(batch_tile, _round_up(n, 8)), 8)
    n_pad = _round_up(n, tb)
    if n_pad != n:
        x = jnp.pad(x, ((0, n_pad - n), (0, 0)))

    # bf16 for the streamed input and the fc1 weight halves HBM traffic on the
    # dominant x read; the MXU consumes bf16 natively with f32 accumulation.
    x_bf16 = x.astype(jnp.bfloat16)
    w1_bf16 = w1_t.astype(jnp.bfloat16)

    grid = (n_pad // tb,)
    resident = lambda shape: pl.BlockSpec(shape, lambda i: (0, 0))

    out = pl.pallas_call(
        _classifier_kernel,
        out_shape=jax.ShapeDtypeStruct((n_pad, num_classes), jnp.float32),
        grid_spec=pltpu.PrefetchScalarGridSpec(
            num_scalar_prefetch=0,
            grid=grid,
            in_specs=[
                pl.BlockSpec((tb, 120), lambda i: (i, 0)),  # x tile (streamed, bf16)
                resident((120, 84)),                        # fc1 W^T (bf16, resident)
                resident((1, 84)),                          # fc1 b   (f32, resident)
                resident((84, num_classes)),                # fc2 W^T (f32, resident)
                resident((1, num_classes)),                 # fc2 b   (f32, resident)
            ],
            out_specs=pl.BlockSpec((tb, num_classes), lambda i: (i, 0)),
        ),
        compiler_params=pltpu.CompilerParams(
            dimension_semantics=("parallel",),
        ),
    )(x_bf16, w1_bf16, b1, w2_t, b2)

    return out[:n]


def _init_linear(key, in_features, out_features):
    """Deterministic torch-style (Kaiming-uniform-ish) init.
    Returns W^T of shape [in, out] and bias of shape [1, out]."""
    kw, kb = jax.random.split(key)
    bound = 1.0 / jnp.sqrt(jnp.float32(in_features))
    w_t = jax.random.uniform(kw, (in_features, out_features), jnp.float32, -bound, bound)
    b = jax.random.uniform(kb, (1, out_features), jnp.float32, -bound, bound)
    return w_t, b


def reference_forward(x, w1_t, b1, w2_t, b2):
    # Mirrors the kernel's precision choices (bf16 x / fc1 weight, f32 accum).
    xb = x.astype(jnp.bfloat16).astype(jnp.float32)
    w1b = w1_t.astype(jnp.bfloat16).astype(jnp.float32)
    h = jnp.tanh(xb @ w1b + b1)
    return h @ w2_t + b2


if __name__ == "__main__":
    key = jax.random.PRNGKey(0)
    kx, k1, k2 = jax.random.split(key, 3)

    NUM_CLASSES = 10

    w1_t, b1 = _init_linear(k1, 120, 84)
    w2_t, b2 = _init_linear(k2, 84, NUM_CLASSES)

    # Small test: N deliberately not a multiple of the tile to exercise padding.
    N = 10
    x = jax.random.normal(kx, (N, 120), jnp.float32)
    out = classifier_forward(x, w1_t, b1, w2_t, b2)
    out = jax.block_until_ready(out)
    ref = reference_forward(x, w1_t, b1, w2_t, b2)
    assert out.shape == (N, NUM_CLASSES)
    assert jnp.allclose(out, ref, atol=1e-3, rtol=1e-3), "mismatch vs JAX reference (small N)"

    # Larger batch: multiple grid steps with the big tile (megacore-shardable).
    N2 = 4096
    x2 = jax.random.normal(kx, (N2, 120), jnp.float32)
    out2 = classifier_forward(x2, w1_t, b1, w2_t, b2, batch_tile=2048)
    out2 = jax.block_until_ready(out2)
    ref2 = reference_forward(x2, w1_t, b1, w2_t, b2)
    assert out2.shape == (N2, NUM_CLASSES)
    assert jnp.allclose(out2, ref2, atol=1e-3, rtol=1e-3), "mismatch vs JAX reference (large N)"

    print("KERNEL_OK")
</pallas_src>

<mosaic_0001>
module attributes {stable_mosaic.version = 11 : i64} {
  func.func @_classifier_kernel(%arg0: i32, %arg1: memref<16x120xbf16, #tpu.memory_space<vmem>>, %arg2: memref<120x84xbf16, #tpu.memory_space<vmem>>, %arg3: memref<1x84xf32, #tpu.memory_space<vmem>>, %arg4: memref<84x10xf32, #tpu.memory_space<vmem>>, %arg5: memref<1x10xf32, #tpu.memory_space<vmem>>, %arg6: memref<16x10xf32, #tpu.memory_space<vmem>>) attributes {dimension_semantics = [#tpu.dimension_semantics<parallel>], iteration_bounds = array<i64: 1>, scalar_prefetch = 0 : i64, scratch_operands = 0 : i64, tpu.core_type = #tpu.core_type<tc>, window_params = [{transform_indices = @transform_0, window_bounds = array<i64: 16, 120>}, {pipeline_mode = #tpu.pipeline_mode<synchronous>, transform_indices = @transform_1, window_bounds = array<i64: 120, 84>}, {pipeline_mode = #tpu.pipeline_mode<synchronous>, transform_indices = @transform_2, window_bounds = array<i64: 1, 84>}, {pipeline_mode = #tpu.pipeline_mode<synchronous>, transform_indices = @transform_3, window_bounds = array<i64: 84, 10>}, {pipeline_mode = #tpu.pipeline_mode<synchronous>, transform_indices = @transform_4, window_bounds = array<i64: 1, 10>}, {transform_indices = @transform_5, window_bounds = array<i64: 16, 10>}]} {
    %c0 = arith.constant 0 : index
    %c0_0 = arith.constant 0 : index
    %0 = vector.load %arg1[%c0, %c0_0] : memref<16x120xbf16, #tpu.memory_space<vmem>>, vector<16x120xbf16>
    %c0_1 = arith.constant 0 : index
    %c0_2 = arith.constant 0 : index
    %1 = vector.load %arg2[%c0_1, %c0_2] : memref<120x84xbf16, #tpu.memory_space<vmem>>, vector<120x84xbf16>
    %cst = arith.constant dense<0.000000e+00> : vector<16x84xf32>
    %2 = tpu.matmul %0, %1, %cst {dimension_numbers = #tpu.dot_dimension_numbers<[1], [0], [0], [1], [0, 0, 1, 1], [], []>} : vector<16x120xbf16>, vector<120x84xbf16>, vector<16x84xf32> -> vector<16x84xf32>
    %c0_3 = arith.constant 0 : index
    %c0_4 = arith.constant 0 : index
    %3 = vector.load %arg3[%c0_3, %c0_4] : memref<1x84xf32, #tpu.memory_space<vmem>>, vector<1x84xf32>
    %4 = vector.broadcast %3 : vector<1x84xf32> to vector<16x84xf32>
    %5 = arith.addf %2, %4 : vector<16x84xf32>
    %6 = math.tanh %5 : vector<16x84xf32>
    %c0_5 = arith.constant 0 : index
    %c0_6 = arith.constant 0 : index
    %7 = vector.load %arg4[%c0_5, %c0_6] : memref<84x10xf32, #tpu.memory_space<vmem>>, vector<84x10xf32>
    %cst_7 = arith.constant dense<0.000000e+00> : vector<16x10xf32>
    %8 = tpu.matmul %6, %7, %cst_7 {dimension_numbers = #tpu.dot_dimension_numbers<[1], [0], [0], [1], [0, 0, 1, 1], [], []>} : vector<16x84xf32>, vector<84x10xf32>, vector<16x10xf32> -> vector<16x10xf32>
    %c0_8 = arith.constant 0 : index
    %c0_9 = arith.constant 0 : index
    %9 = vector.load %arg5[%c0_8, %c0_9] : memref<1x10xf32, #tpu.memory_space<vmem>>, vector<1x10xf32>
    %10 = vector.broadcast %9 : vector<1x10xf32> to vector<16x10xf32>
    %11 = arith.addf %8, %10 : vector<16x10xf32>
    %c0_10 = arith.constant 0 : index
    %c0_11 = arith.constant 0 : index
    %12 = vector.load %arg6[%c0_10, %c0_11] : memref<16x10xf32, #tpu.memory_space<vmem>>, vector<16x10xf32>
    tpu.vector_store %arg6[%c0_10, %c0_11], %11 {strides = array<i32>} : memref<16x10xf32, #tpu.memory_space<vmem>>, vector<16x10xf32>,
    return
  }
  func.func @transform_0(%arg0: i32) -> (i32, i32) {
    %c0_i32 = arith.constant 0 : i32
    %c0_i32_0 = arith.constant 0 : i32
    return %arg0, %c0_i32 : i32, i32
  }
  func.func @transform_1(%arg0: i32) -> (i32, i32) {
    %c0_i32 = arith.constant 0 : i32
    %c0_i32_0 = arith.constant 0 : i32
    %c0_i32_1 = arith.constant 0 : i32
    return %c0_i32, %c0_i32_0 : i32, i32
  }
  func.func @transform_2(%arg0: i32) -> (i32, i32) {
    %c0_i32 = arith.constant 0 : i32
    %c0_i32_0 = arith.constant 0 : i32
    %c0_i32_1 = arith.constant 0 : i32
    return %c0_i32, %c0_i32_0 : i32, i32
  }
  func.func @transform_3(%arg0: i32) -> (i32, i32) {
    %c0_i32 = arith.constant 0 : i32
    %c0_i32_0 = arith.constant 0 : i32
    %c0_i32_1 = arith.constant 0 : i32
    return %c0_i32, %c0_i32_0 : i32, i32
  }
  func.func @transform_4(%arg0: i32) -> (i32, i32) {
    %c0_i32 = arith.constant 0 : i32
    %c0_i32_0 = arith.constant 0 : i32
    %c0_i32_1 = arith.constant 0 : i32
    return %c0_i32, %c0_i32_0 : i32, i32
  }
  func.func @transform_5(%arg0: i32) -> (i32, i32) {
    %c0_i32 = arith.constant 0 : i32
    %c0_i32_0 = arith.constant 0 : i32
    return %arg0, %c0_i32 : i32, i32
  }
}

</mosaic_0001>

<bundles_post_ra>
// kernel: classifier_forward.1
= control target key start
LH: loop header
LB: loop body
LE: loop exit
PB: predicated region body
PF: predicated region fallthrough
CT: control target
= control target key end

     0   :  { %v413_v1 = vmov 0.0   ;;  %vm414_vm0 = vmmov 0   ;;  %s529_s0 = inlined_call_operand.vmem [shape: bf16[16,120], index: 0, kind: input, shape index: {}]   ;;  %s530_s1 = inlined_call_operand.vmem [shape: bf16[120,84], index: 1, kind: input, shape index: {}]   ;;  %s531_s2 = inlined_call_operand.vmem [shape: f32[1,84], index: 2, kind: input, shape index: {}]   ;;  %s532_s3 = inlined_call_operand.vmem [shape: f32[84,10], index: 3, kind: input, shape index: {}]   ;;  %s533_s4 = inlined_call_operand.vmem [shape: f32[1,10], index: 4, kind: input, shape index: {}]   ;;  %s534_s5 = inlined_call_operand.hbm [shape: f32[16,10], index: 5, kind: output, shape index: {}]  }
   0x1   :  { %v376_v0 = vld [vmem:[%s530_s1] sm:$0xff]   ;;  %306 = vmatprep.subr.bf16.mxu0 %v413_v1  ;;  %v377_v2 = vld [vmem:[%s530_s1 + $0x8] sm:$0xff]   ;;  %322 = vmatprep.mubr.msk.bf16.mxu0 %vm414_vm0, %v413_v1  ;;  %v378_v3 = vld [vmem:[%s530_s1 + $0x10] sm:$0xff]  }
   0x2   :  { %307 = vmatpush3.bf16.msra.mxu0 %v376_v0  ;;  %v147_v4 = vld [vmem:[%s532_s3] sm:$0xff]  ;;  %v148_v5 = vld [vmem:[%s532_s3 + $0x8] sm:$0xff]  ;;  %v149_v6 = vld [vmem:[%s532_s3 + $0x10] sm:$0xff] }
   0x3   :  { %308 = vmatprep.subr.bf16.mxu0 %v413_v1  ;;  %v150_v7 = vld [vmem:[%s532_s3 + $0x18] sm:$0xff]  ;;  %v351_v9 = vpack.c.bf16 %v148_v5, %v147_v4 }
   0x4   :  { %v379_v8 = vld [vmem:[%s530_s1 + $0x18] sm:$0xff]   ;;  %v355_v10 = vpack.c.bf16 %v150_v7, %v149_v6 }
   0x6   :  { %309 = vmatpush3.bf16.msra.mxu0 %v377_v2 }
   0x7   :  { %310 = vmatprep.subr.bf16.mxu0 %v413_v1 }
   0xa   :  { %311 = vmatpush3.bf16.msra.mxu0 %v378_v3 }
   0xb   :  { %10 = vsyncpa [#allocation3], 0  ;;  %312 = vmatprep.subr.bf16.mxu0 %v413_v1  ;;  %352 = vmatprep.subr.bf16.mxu1 %v351_v9  ;;  %v380_v11 = vld [vmem:[%s530_s1 + $0x20] sm:$0xff]   ;;  %v381_v12 = vld [vmem:[%s530_s1 + $0x28] sm:$0xff]   ;;  %vm100_vm1 = vcmask 1043456   ;;  %vm96_vm2 = vcmask 982016  }
   0xc   :  { %354 = vmatpush3.bf16.msra.mxu1 %v351_v9  ;;  %v382_v13 = vld [vmem:[%s530_s1 + $0x30] sm:$0xff]   ;;  %v383_v14 = vld [vmem:[%s530_s1 + $0x38] ss:$0 sps:$4 sm:$0xff]   ;;  %v384_v16 = vld [vmem:[%s529_s0] sm:$0xff]   ;;  %vm165_vm3 = vcmask 687104   ;;  %s415_s9 = smov [#allocation2]  }
   0xd   :  { %356 = vmatprep.subr.bf16.mxu1 %v355_v10  ;;  %v102_v15 = vsel %vm100_vm1, %v383_v14, 0  ;;  %v151_v17 = vld [vmem:[%s532_s3 + $0x20] sm:$0xff]  ;;  %v152_v18 = vld [vmem:[%s532_s3 + $0x28] sm:$0xff]  ;;  %v153_v20 = vld [vmem:[%s532_s3 + $0x30] sm:$0xff]  ;;  %s258_s10 = sshll.u32 %s415_s9, 4  ;;  %vm250_vm4 = vcmask 80896   ;;  %s259_s10 = int_to_ptr.vmem [resolvable:$true] %s258_s10 }
   0xe   :  { %313 = vmatpush3.bf16.msra.mxu0 %v379_v8  ;;  %v359_v19 = vpack.c.bf16 %v152_v18, %v151_v17  ;;  %v154_v21 = vld [vmem:[%s532_s3 + $0x38] sm:$0xff]  ;;  %v155_v23 = vld [vmem:[%s532_s3 + $0x40] sm:$0xff]  ;;  %v156_v24 = vld [vmem:[%s532_s3 + $0x48] sm:$0xff]  ;;  %p394_p1 = scmp.lt.s32.totalorder %s259_s10, %s259_s10 }
   0xf   :  { %314 = vmatprep.subr.bf16.mxu0 %v413_v1  ;;  %v363_v22 = vpack.c.bf16 %v154_v21, %v153_v20  ;;  %v367_v25 = vpack.c.bf16 %v156_v24, %v155_v23  ;;  %v157_v26 = vld [vmem:[%s532_s3 + $0x50] sm:$0xf]  ;;  %v269_v27 = vld [vmem:[%s531_s2] ss:$0 sm:$0xff]  ;;  %s389_s2 = scalar_lea.vmem %s259_s10, 256 }
  0x10   :  { %358 = vmatpush3.bf16.msra.mxu1 %v355_v10  ;;  %v280_v36 = vld [vmem:[%s533_s4] ss:$0 sm:$0xff]  ;;  %p390_p0 = scmp.ne.s32.totalorder %s259_s10, %s389_s2  ;;  %p395_p2 = scmp.lt.s32.totalorder %s389_s2, %s389_s2 }
  0x11   :  { %360 = vmatprep.subr.bf16.mxu1 %v359_v19 }
  0x12   :  { %315 = vmatpush3.bf16.msra.mxu0 %v380_v11  ;;  %p396_p3 = por %p395_p2, %p394_p1 }
  0x13   :  { %316 = vmatprep.subr.bf16.mxu0 %v413_v1 }
  0x14   :  { %362 = vmatpush3.bf16.msra.mxu1 %v359_v19  ;;  %p397_p4 = pnand %p396_p3, %p390_p0 }
  0x15   :  { %364 = vmatprep.subr.bf16.mxu1 %v363_v22 }
  0x16   :  { %317 = vmatpush3.bf16.msra.mxu0 %v381_v12 }
  0x17   :  { %318 = vmatprep.subr.bf16.mxu0 %v413_v1 }
  0x18   :  { %366 = vmatpush3.bf16.msra.mxu1 %v363_v22 }
  0x19   :  { %368 = vmatprep.subr.bf16.mxu1 %v367_v25 }
  0x1a   :  { %319 = vmatpush3.bf16.msra.mxu0 %v382_v13 }
  0x1b   :  { %320 = vmatprep.subr.bf16.mxu0 %v413_v1 }
  0x1c   :  { %370 = vmatpush3.bf16.msra.mxu1 %v367_v25 }
  0x1d   :  { %346 = vmatprep.subr.msk.mxu1 %vm100_vm1, %v157_v26 }
  0x1e   :  { %321 = vmatpush3.bf16.msra.mxu0 %v102_v15 }
  0x20   :  { %347 = vmatpush3.msk.msra.mxu1 %vm100_vm1, %v157_v26 }
  0x21   :  { %323 = vmatmul.mubr.msk.bf16.vlgmr.msra.gmra.mrb[0].mxu0 %vm96_vm2, %v384_v16 }
  0xf4   :  { %v138_v28 = vpop.f32.mrb[0].mxu0 }
  0xf5   :  { %v139_v29 = vadd.f32 %v269_v27, %v138_v28  ;;  %v324_v30 = vpop.f32.mrb[1].mxu0 }
  0xf6   :  { %v141_v31 = vpop.f32.mrb[2].mxu0 }
  0xf7   :  { %385 = vtanh.f32 %v139_v29  ;;  %v142_v32 = vadd.f32 %v269_v27, %v141_v31  ;;  %v325_v33 = vpop.f32.mrb[3].mxu0 }
  0xf9   :  { %387 = vtanh.f32 %v142_v32 }
 0x101   :  { %v386_v34 = vpop.eup %385 }
 0x102   :  { %348 = vmatprep.mubr.msk.f32.mxu1 %vm165_vm3, %v386_v34 }
 0x103   :  { %v388_v35 = vpop.eup %387 }
 0x104   :  { %349 = vmatmul.mubr.msk.f32.vlgmr.msra.gmra.mrb[0].mxu1 %vm165_vm3, %v388_v35 }
 0x1d7   :  { %v350_v37 = vpop.f32.mrb[0].mxu1 }
 0x1d8   :  { %v247_v38 = vadd.f32 %v350_v37, %v280_v36  ;;  %v241_v39 = vpop.f32.mrb[1].mxu1 }
 0x1d9   :  { %v242_v40 = vadd.f32 %v280_v36, %v241_v39 }
 0x1da   :  { %252 = vst.msk [vmem:[#allocation2 + $0x8] sm:$0xff] %vm250_vm4, %v247_v38 }
 0x1db   :  { %251 = vst.msk [vmem:[#allocation2] sm:$0xff] %vm250_vm4, %v242_v40 }
 0x1dc   :  { %400 = shalt.err (!%p397_p4)
}
 0x1dd   :  { %s401_s4 = scalar_lea.hbm %s534_s5, 256 }
 0x1de   :  { %p402_p5 = scmp.ne.s32.totalorder %s534_s5, %s401_s4  ;;  %p405_p6 = scmp.lt.u32.totalorder %s401_s4, %s534_s5 }
 0x1e0   :  { %p407_p7 = pnand %p405_p6, %p402_p5 }
 0x1e2   :  { %410 = shalt.err (!%p407_p7)
}
 0x1e3   :  { %s416_s17 = smov 128   ;;  %s417_s18 = smov 8  }
 0x1e4   :  { %264 = dma.vmem_to_hbm [thread:$0]  %s259_s10, 256, %s534_s5, [#allocation3], %s416_s17, %s416_s17, %s417_s18  }
 0x1e5   :  { %411 = dma.done.wait [#allocation3], 256  }
 0x1e6   :  { %412 = vsyncadd [#allocation3], 4294967040 }
 0x1e7   :  { %268 = vsyncpa [#allocation3], 1 }

</bundles_post_ra>
